<compile_context>
chip_gen: v5e
topology: v5e:2x2
jax: 0.10.0
libtpu: 0.0.40
codegen_flags: <defaults>
</compile_context>

<pallas_src>
import functools

import jax
import jax.numpy as jnp
from jax.experimental import pallas as pl
from jax.experimental.pallas import tpu as pltpu

ALPHA = 0.8
GAMMA = 2.0
SMOOTH = 1.0

_LANES = 128
_TR_MAX = 32           # keep the 4 (tr, 128) f32 accumulators vreg-resident
_TK_MAX = 64 * 1024    # lane (spatial) tile upper bound
_PAD_LOGIT = -1.0e4    # sigmoid/BCE of this logit (with target 0) are exactly 0


def _round_up(x, m):
    return (x + m - 1) // m * m


def _fd_stats_kernel(x_ref, t_ref, out_ref, *, nblk, unroll):
    """Streams one (tr, tk) block 128 lanes at a time and accumulates the four
    lane-dense (tr, 128) partial sums (bce, p*t, p, t) into the four adjacent
    128-lane slabs of the packed (tr, 512) output block."""
    k = pl.program_id(2)          # reduction (column-tile) axis, innermost

    @pl.when(k == 0)
    def _():
        out_ref[...] = jnp.zeros_like(out_ref)

    tr = x_ref.shape[0]

    def body(j, carry):
        bce_a, int_a, p_a, t_a = carry
        off = pl.multiple_of(j * _LANES, _LANES)
        x = x_ref[:, pl.ds(off, _LANES)].astype(jnp.float32)   # .float() in ref
        t = t_ref[:, pl.ds(off, _LANES)].astype(jnp.float32)
        # sigmoid and the numerically stable with-logits BCE share one exp(-|x|)
        e = jnp.exp(-jnp.abs(x))
        inv = pl.reciprocal(1.0 + e, approx=True)               # EUP vrcp
        p = jnp.where(x >= 0.0, inv, e * inv)                   # sigmoid(x)
        bce = jnp.maximum(x, 0.0) - x * t + jnp.log1p(e)
        return (bce_a + bce, int_a + p * t, p_a + p, t_a + t)

    zero = jnp.zeros((tr, _LANES), jnp.float32)
    bce_a, int_a, p_a, t_a = jax.lax.fori_loop(
        0, nblk, body, (zero, zero, zero, zero), unroll=unroll)

    out_ref[:, 0 * _LANES:1 * _LANES] += bce_a
    out_ref[:, 1 * _LANES:2 * _LANES] += int_a
    out_ref[:, 2 * _LANES:3 * _LANES] += p_a
    out_ref[:, 3 * _LANES:4 * _LANES] += t_a


def _vmem_limit_bytes():
    """Generation-aware scoped-VMEM budget (v7x has only 64 MiB per TensorCore)."""
    try:
        cap = int(pltpu.get_tpu_info().vmem_capacity_bytes)
    except Exception:
        cap = 64 << 20            # conservative (v7x-sized) fallback
    return max(16 << 20, min(cap // 2, 64 << 20))


def _pick_row_tile(rows):
    """Row (sublane) tile: multiple of 8, <= _TR_MAX, minimizing padded rows."""
    best_tr, best_rp = 8, _round_up(rows, 8)
    for cand in range(16, _TR_MAX + 1, 8):
        rp = _round_up(rows, cand)
        if rp < best_rp or (rp == best_rp and cand > best_tr):
            best_tr, best_rp = cand, rp
    return best_tr, best_rp


def _pick_col_tile(cols_per_core, tr, pair_bytes, vmem_limit):
    """Largest multiple of 128 that divides cols_per_core and fits the VMEM budget."""
    mc = cols_per_core // _LANES
    budget = int(vmem_limit * 0.6)                     # headroom for output + temps
    cap_cols = budget // max(1, 2 * tr * pair_bytes)   # 2 = double-buffered inputs
    cap_blocks = max(1, min(cap_cols // _LANES, _TK_MAX // _LANES, mc))
    j = cap_blocks
    while mc % j != 0:
        j -= 1
    return j * _LANES


def fd_loss(inputs, targets):
    """FDLoss (FocalLoss + dice_loss) for NCHW logits/binary targets.

    `inputs` may be f32 or bf16 logits and `targets` may be float, bf16, bool or
    (u)int8 masks — the kernel upcasts to f32 — which cuts HBM traffic on the
    memory-bound v5e/v6e.  Returns the scalar f32 loss."""
    assert inputs.shape == targets.shape and inputs.ndim == 4
    n, c, h, w = inputs.shape
    rows, cols = n * c, h * w

    x2d = inputs.reshape(rows, cols)
    t2d = targets.reshape(rows, cols)

    xb = jnp.dtype(x2d.dtype).itemsize
    tb = jnp.dtype(t2d.dtype).itemsize
    vmem_limit = _vmem_limit_bytes()

    tr, rows_p = _pick_row_tile(rows)
    row_tiles = rows_p // tr
    cols128 = _round_up(cols, _LANES)
    m128 = cols128 // _LANES

    # 2-way split of the spatial reduction for v7x megacore when the row axis
    # alone cannot feed both TensorCores (harmless size-2 loop on v5e/v6e).
    ncore = 2 if (row_tiles == 1 and m128 >= 2 and m128 % 2 == 0) else 1
    cols_per_core = cols128 // ncore
    tk = _pick_col_tile(cols_per_core, tr, xb + tb, vmem_limit)
    k_tiles = cols_per_core // tk

    # Pad columns only to the next multiple of 128 (never to a multiple of tk).
    # Padded logits are a large negative constant and padded targets are 0, so
    # every padded element contributes exactly 0 to all four partial sums — no
    # in-kernel masking needed.  Padded rows are dropped in the combine below.
    if (rows_p, cols128) != (rows, cols):
        x2d = jnp.pad(x2d, ((0, rows_p - rows), (0, cols128 - cols)),
                      constant_values=_PAD_LOGIT)
        t2d = jnp.pad(t2d, ((0, rows_p - rows), (0, cols128 - cols)))

    nblk = tk // _LANES
    if nblk <= 16:
        unroll = nblk
    else:
        unroll = 1
        for u in (8, 7, 6, 5, 4, 3, 2):
            if nblk % u == 0:
                unroll = u
                break

    kernel = functools.partial(_fd_stats_kernel, nblk=nblk, unroll=unroll)

    out_shape = jax.ShapeDtypeStruct((rows_p, ncore * 4 * _LANES), jnp.float32)

    cost = pl.CostEstimate(
        flops=int(12 * rows_p * cols128),
        transcendentals=int(3 * rows_p * cols128),
        bytes_accessed=int(rows_p * cols128 * (xb + tb)
                           + rows_p * ncore * 4 * _LANES * 4),
    )

    packed = pl.pallas_call(
        kernel,
        out_shape=out_shape,
        grid_spec=pltpu.PrefetchScalarGridSpec(
            num_scalar_prefetch=0,
            grid=(ncore, row_tiles, k_tiles),
            in_specs=[
                pl.BlockSpec((tr, tk), lambda c, r, k, kt=k_tiles: (r, c * kt + k)),
                pl.BlockSpec((tr, tk), lambda c, r, k, kt=k_tiles: (r, c * kt + k)),
            ],
            out_specs=pl.BlockSpec((tr, 4 * _LANES), lambda c, r, k: (r, c)),
        ),
        compiler_params=pltpu.CompilerParams(
            dimension_semantics=("parallel", "parallel", "arbitrary"),
            vmem_limit_bytes=int(vmem_limit)),
        cost_estimate=cost,
    )(x2d, t2d)

    # Tiny final combine in plain JAX: drop padded rows, one cross-lane reduce.
    stats = packed[:rows].reshape(rows, ncore, 4, _LANES).sum(axis=(1, 3))  # (rows, 4)
    bce_sum = stats[:, 0].sum()
    inter_r, p_r, t_r = stats[:, 1], stats[:, 2], stats[:, 3]

    bce_mean = bce_sum / jnp.float32(rows * cols)
    focal = ALPHA * (1.0 - jnp.exp(-bce_mean)) ** GAMMA * bce_mean
    dice_r = 1.0 - (2.0 * inter_r + SMOOTH) / (p_r + t_r + SMOOTH)
    return focal + jnp.mean(dice_r)


def fd_loss_ref(inputs, targets):
    """Pure-JAX reference mirroring the PyTorch semantics."""
    x = inputs.astype(jnp.float32)
    t = targets.astype(jnp.float32)
    p = jax.nn.sigmoid(x)
    bce = jnp.mean(jnp.maximum(x, 0.0) - x * t + jnp.log1p(jnp.exp(-jnp.abs(x))))
    focal = ALPHA * (1.0 - jnp.exp(-bce)) ** GAMMA * bce
    inter = jnp.sum(p * t, axis=(2, 3))
    dice = 1.0 - (2.0 * inter + SMOOTH) / (
        jnp.sum(p, axis=(2, 3)) + jnp.sum(t, axis=(2, 3)) + SMOOTH)
    return focal + jnp.mean(dice)


if __name__ == "__main__":
    key = jax.random.PRNGKey(0)

    # 1) base shape (no padding, 2-way megacore column split)
    # 2) non-divisible spatial + non-multiple-of-8 rows (padded cols/rows path)
    # 3) larger spatial size (multi-chunk fori_loop reduction)
    shapes = [(2, 4, 16, 16), (2, 3, 10, 10), (2, 4, 96, 96)]

    ok = True
    for (N, C, H, W) in shapes:
        key, k1, k2 = jax.random.split(key, 3)
        inputs = jax.random.normal(k1, (N, C, H, W), dtype=jnp.float32)      # logits
        targets = (jax.random.uniform(k2, (N, C, H, W)) > 0.5).astype(jnp.float32)

        loss = jax.block_until_ready(fd_loss(inputs, targets))
        ref = jax.block_until_ready(fd_loss_ref(inputs, targets))
        # Tolerance accounts for the approximate-reciprocal sigmoid (EUP vrcp).
        if not jnp.allclose(loss, ref, rtol=2e-3, atol=2e-4):
            ok = False
            print(f"MISMATCH shape={(N, C, H, W)}: kernel={loss} ref={ref}")

    assert ok
    print("KERNEL_OK")
</pallas_src>

<mosaic_0001>
module attributes {stable_mosaic.version = 11 : i64} {
  func.func @_fd_stats_kernel(%arg0: i32, %arg1: i32, %arg2: i32, %arg3: memref<8x128xf32, #tpu.memory_space<vmem>>, %arg4: memref<8x128xf32, #tpu.memory_space<vmem>>, %arg5: memref<8x512xf32, #tpu.memory_space<vmem>>) attributes {dimension_semantics = [#tpu.dimension_semantics<parallel>, #tpu.dimension_semantics<parallel>, #tpu.dimension_semantics<arbitrary>], iteration_bounds = array<i64: 2, 1, 1>, scalar_prefetch = 0 : i64, scratch_operands = 0 : i64, tpu.core_type = #tpu.core_type<tc>, window_params = [{transform_indices = @transform_0, window_bounds = array<i64: 8, 128>}, {transform_indices = @transform_1, window_bounds = array<i64: 8, 128>}, {transform_indices = @transform_2, window_bounds = array<i64: 8, 512>}]} {
    %c0_i32 = arith.constant 0 : i32
    %0 = arith.cmpi eq, %arg2, %c0_i32 : i32
    %1 = arith.extui %0 : i1 to i32
    %c0_i32_0 = arith.constant 0 : i32
    %2 = arith.cmpi ne, %1, %c0_i32_0 : i32
    scf.if %2 {
      %cst_20 = arith.constant 0.000000e+00 : f32
      %44 = vector.broadcast %cst_20 : f32 to vector<8x512xf32>
      %c0_21 = arith.constant 0 : index
      %c0_22 = arith.constant 0 : index
      %45 = vector.load %arg5[%c0_21, %c0_22] : memref<8x512xf32, #tpu.memory_space<vmem>>, vector<8x512xf32>
      tpu.vector_store %arg5[%c0_21, %c0_22], %44 {strides = array<i32>} : memref<8x512xf32, #tpu.memory_space<vmem>>, vector<8x512xf32>,
    } else {
    }
    %cst = arith.constant 0.000000e+00 : f32
    %3 = vector.broadcast %cst : f32 to vector<8x128xf32>
    %c0_i32_1 = arith.constant 0 : i32
    %c128_i32 = arith.constant 128 : i32
    %4 = arith.muli %c0_i32_1, %c128_i32 : i32
    %5 = tpu.assume_multiple %4, 128 : i32
    %c0 = arith.constant 0 : index
    %6 = arith.index_cast %5 : i32 to index
    %7 = vector.load %arg3[%c0, %6] : memref<8x128xf32, #tpu.memory_space<vmem>>, vector<8x128xf32>
    %c0_2 = arith.constant 0 : index
    %8 = arith.index_cast %5 : i32 to index
    %9 = vector.load %arg4[%c0_2, %8] : memref<8x128xf32, #tpu.memory_space<vmem>>, vector<8x128xf32>
    %10 = math.absf %7 : vector<8x128xf32>
    %cst_3 = arith.constant 0.000000e+00 : f32
    %11 = vector.broadcast %cst_3 : f32 to vector<8x128xf32>
    %12 = arith.subf %11, %10 : vector<8x128xf32>
    %13 = math.exp %12 : vector<8x128xf32>
    %cst_4 = arith.constant 1.000000e+00 : f32
    %14 = vector.broadcast %cst_4 : f32 to vector<8x128xf32>
    %15 = arith.addf %14, %13 : vector<8x128xf32>
    %16 = tpu.reciprocal %15 {approx = true} : vector<8x128xf32> -> vector<8x128xf32>
    %cst_5 = arith.constant 0.000000e+00 : f32
    %17 = vector.broadcast %cst_5 : f32 to vector<8x128xf32>
    %18 = arith.cmpf oge, %7, %17 : vector<8x128xf32>
    %19 = arith.mulf %13, %16 : vector<8x128xf32>
    %20 = arith.select %18, %16, %19 : vector<8x128xi1>, vector<8x128xf32>
    %cst_6 = arith.constant 0.000000e+00 : f32
    %21 = vector.broadcast %cst_6 : f32 to vector<8x128xf32>
    %22 = arith.maximumf %7, %21 : vector<8x128xf32>
    %23 = arith.mulf %7, %9 : vector<8x128xf32>
    %24 = arith.subf %22, %23 : vector<8x128xf32>
    %25 = math.log1p %13 : vector<8x128xf32>
    %26 = arith.addf %24, %25 : vector<8x128xf32>
    %27 = arith.addf %3, %26 : vector<8x128xf32>
    %28 = arith.mulf %20, %9 : vector<8x128xf32>
    %29 = arith.addf %3, %28 : vector<8x128xf32>
    %30 = arith.addf %3, %20 : vector<8x128xf32>
    %31 = arith.addf %3, %9 : vector<8x128xf32>
    %c1_i32 = arith.constant 1 : i32
    %c0_7 = arith.constant 0 : index
    %c0_8 = arith.constant 0 : index
    %32 = vector.load %arg5[%c0_7, %c0_8] : memref<8x512xf32, #tpu.memory_space<vmem>>, vector<8x128xf32>
    %33 = arith.addf %32, %27 : vector<8x128xf32>
    %c0_9 = arith.constant 0 : index
    %c0_10 = arith.constant 0 : index
    %34 = vector.load %arg5[%c0_9, %c0_10] : memref<8x512xf32, #tpu.memory_space<vmem>>, vector<8x128xf32>
    tpu.vector_store %arg5[%c0_9, %c0_10], %33 {strides = array<i32>} : memref<8x512xf32, #tpu.memory_space<vmem>>, vector<8x128xf32>,
    %c0_11 = arith.constant 0 : index
    %c128 = arith.constant 128 : index
    %35 = vector.load %arg5[%c0_11, %c128] : memref<8x512xf32, #tpu.memory_space<vmem>>, vector<8x128xf32>
    %36 = arith.addf %35, %29 : vector<8x128xf32>
    %c0_12 = arith.constant 0 : index
    %c128_13 = arith.constant 128 : index
    %37 = vector.load %arg5[%c0_12, %c128_13] : memref<8x512xf32, #tpu.memory_space<vmem>>, vector<8x128xf32>
    tpu.vector_store %arg5[%c0_12, %c128_13], %36 {strides = array<i32>} : memref<8x512xf32, #tpu.memory_space<vmem>>, vector<8x128xf32>,
    %c0_14 = arith.constant 0 : index
    %c256 = arith.constant 256 : index
    %38 = vector.load %arg5[%c0_14, %c256] : memref<8x512xf32, #tpu.memory_space<vmem>>, vector<8x128xf32>
    %39 = arith.addf %38, %30 : vector<8x128xf32>
    %c0_15 = arith.constant 0 : index
    %c256_16 = arith.constant 256 : index
    %40 = vector.load %arg5[%c0_15, %c256_16] : memref<8x512xf32, #tpu.memory_space<vmem>>, vector<8x128xf32>
    tpu.vector_store %arg5[%c0_15, %c256_16], %39 {strides = array<i32>} : memref<8x512xf32, #tpu.memory_space<vmem>>, vector<8x128xf32>,
    %c0_17 = arith.constant 0 : index
    %c384 = arith.constant 384 : index
    %41 = vector.load %arg5[%c0_17, %c384] : memref<8x512xf32, #tpu.memory_space<vmem>>, vector<8x128xf32>
    %42 = arith.addf %41, %31 : vector<8x128xf32>
    %c0_18 = arith.constant 0 : index
    %c384_19 = arith.constant 384 : index
    %43 = vector.load %arg5[%c0_18, %c384_19] : memref<8x512xf32, #tpu.memory_space<vmem>>, vector<8x128xf32>
    tpu.vector_store %arg5[%c0_18, %c384_19], %42 {strides = array<i32>} : memref<8x512xf32, #tpu.memory_space<vmem>>, vector<8x128xf32>,
    return
  }
  func.func @transform_0(%arg0: i32, %arg1: i32, %arg2: i32) -> (i32, i32) {
    %c1_i32 = arith.constant 1 : i32
    %0 = arith.muli %arg0, %c1_i32 : i32
    %1 = arith.addi %0, %arg2 : i32
    %c0_i32 = arith.constant 0 : i32
    return %arg1, %1 : i32, i32
  }
  func.func @transform_1(%arg0: i32, %arg1: i32, %arg2: i32) -> (i32, i32) {
    %c1_i32 = arith.constant 1 : i32
    %0 = arith.muli %arg0, %c1_i32 : i32
    %1 = arith.addi %0, %arg2 : i32
    %c0_i32 = arith.constant 0 : i32
    return %arg1, %1 : i32, i32
  }
  func.func @transform_2(%arg0: i32, %arg1: i32, %arg2: i32) -> (i32, i32) {
    %c0_i32 = arith.constant 0 : i32
    return %arg1, %arg0 : i32, i32
  }
}

</mosaic_0001>

<bundles_post_ra>
// kernel: tpu_custom_call.1
= control target key start
LH: loop header
LB: loop body
LE: loop exit
PB: predicated region body
PF: predicated region fallthrough
CT: control target
= control target key end

     0   :  { %7 = vsyncpa [#allocation3], 0  ;;  %s810_s0 = inlined_call_operand.hbm [shape: f32[8,256], index: 0, kind: input, shape index: {}]   ;;  %s811_s1 = inlined_call_operand.hbm [shape: f32[8,256], index: 1, kind: input, shape index: {}]   ;;  %s812_s2 = inlined_call_operand.hbm [shape: f32[8,1024], index: 2, kind: output, shape index: {}]  }
   0x1   :  { %9 = vsyncpa [#allocation3 + $0x1], 0 }
   0x2   :  { %10 = vsyncpa [#allocation6], 0 }
   0x3   :  { %12 = vsyncpa [#allocation6 + $0x1], 0 }
   0x4   :  { %13 = vsyncpa [#allocation4], 0 }
   0x5   :  { %15 = vsyncpa [#allocation4 + $0x1], 0  ;;  %s674_s9 = smov 0   ;;  %s676_s10 = smov 0  }
   0x6   :  { %s678_s11 = smov 0   ;;  %s680_s12 = smov 0  }
   0x7   :  { %s682_s13 = smov 0   ;;  %s684_s14 = smov 0  }
   0x8 LB: > { %s419_s15 = sadd.s32 4294967295, %s657_s14   ;;  %s420_s16 = sadd.s32 4294967294, %s657_s14   ;;  %s657_s14 = sphi %s684_s14, %s21_s14   ;;  %s653_s13 = sphi %s682_s13, %s821_s13   ;;  %s649_s12 = sphi %s680_s12, %s820_s12   ;;  %s645_s11 = sphi %s678_s11, %s819_s11   ;;  %s641_s10 = sphi %s676_s10, %s818_s10   ;;  %s637_s9 = sphi %s674_s9, %s817_s9  }
   0x9   : > { %s40_s17 = sadd.s32 1, %s653_s13  ;;  %s51_s18 = sadd.s32 1, %s645_s11 }
   0xa   : > { %p42_p0 = scmp.ge.s32.totalorder %s40_s17, 2  ;;  %p58_p1 = scmp.ne.s32.totalorder %s645_s11, %s641_s10 }
   0xb   : > { %p59_p2 = scmp.eq.s32.totalorder %s657_s14, 0  ;;  %p64_p3 = scmp.ne.s32.totalorder %s641_s10, %s637_s9 }
   0xc   : > { %s823_s17 = smov (%p42_p0, %s40_s17), 0  ;;  %p65_p5 = scmp.eq.s32.totalorder %s419_s15, 0 }
   0xd   : > { %p715_p4 = por %p59_p2, %p58_p1  ;;  %s47_s20 = ssub.s32 %s653_s13, %s823_s17 }
   0xe   : > { %p120_p6 = scmp.eq.s32.totalorder %s419_s15, 1  ;;  %p49_p7 = scmp.eq.s32.totalorder %s47_s20, 0 }
   0xf   : > { %p721_p8 = por %p65_p5, %p64_p3  ;;  %p126_p10 = scmp.eq.s32.totalorder %s420_s16, 1 }
  0x10   : > { %p725_p9 = por %p120_p6, %p58_p1  ;;  %p422_p12 = scmp.ge.s32.totalorder %s657_s14, 2 }
  0x11   : > { %s730_s23 = scalar_select %p49_p7, %s645_s11, %s51_s18  }
  0x12   : > { %p732_p11 = por %p126_p10, %p64_p3  ;;  %p454_p13 = scmp.lt.s32.totalorder %s657_s14, 2 }
  0x13   : > { %s146_s25 = sand.u32 1, %s645_s11   ;;  %s424_s27 = sshll.u32 %s653_s13, 3 }
  0x14   : > { %s423_s26 = sshll.u32 %s146_s25, 3  ;;  %s157_s30 = scalar_lea.hbm %s810_s0, %s424_s27 }
  0x15   : > { %s150_s3 = scalar_lea.vmem [#allocation2], %s423_s26  ;;  %s159_s5 = sshll.u32 %s157_s30, 4  ;;  %s160_s5 = int_to_ptr.hbm [resolvable:$true] %s159_s5 }
  0x16   : > { %s161_s4 = sshll.u32 %s150_s3, 4  ;;  %p444_p0 = pnand %p454_p13, %p715_p4  ;;  %s162_s4 = int_to_ptr.vmem [resolvable:$true] %s161_s4 }
  0x17   : > { %p427_p1 = scmp.ge.s32.totalorder %s657_s14, 1  ;;  %p188_p2 = scmp.lt.s32.totalorder %s657_s14, 3 }
  0x18   : > { %s147_s6 = scalar_lea.sflag [#allocation3], %s146_s25  ;;  %s179_s15 = scalar_lea.hbm %s811_s1, %s424_s27 }
  0x19   : > { %446 = dma.hbm_to_vmem [thread:$0]  (!%p444_p0), %s160_s5, 128, %s162_s4, %s147_s6  }
  0x1a   : > { %p189_p3 = pnand %p427_p1, %p188_p2  ;;  %s172_s16 = scalar_lea.vmem [#allocation5], %s423_s26 }
  0x1b   : > { %s183_s18 = sshll.u32 %s172_s16, 4  ;;  %s181_s20 = sshll.u32 %s179_s15, 4  ;;  %s184_s18 = int_to_ptr.vmem [resolvable:$true] %s183_s18  ;;  %s182_s20 = int_to_ptr.hbm [resolvable:$true] %s181_s20 }
  0x1c   : > { %s169_s28 = scalar_lea.sflag [#allocation6], %s146_s25  ;;  %192 = sbr.rel (%p189_p3) target bundleno = 68 (0x44), region = 28 }
  0x1d   : > { %449 = dma.hbm_to_vmem [thread:$0]  (!%p444_p0), %s182_s20, 128, %s184_s18, %s169_s28  }
  0x1e   : > { %s751_s19 = sand.u32 (!%p189_p3), 1, %s641_s10  }
  0x1f   : > { %s428_s29 = sshll.u32 (!%p189_p3), %s751_s19, 3  ;;  %s195_s30 = scalar_lea.sflag (!%p189_p3), [#allocation3], %s751_s19 }
  0x20   : > { %s198_s3 = scalar_lea.vmem (!%p189_p3), [#allocation2], %s428_s29 }
  0x21   : > { %624 = dma.done.wait (%p721_p8), %s195_s30, 128  }
  0x22   : > { %626 = vsyncadd (%p721_p8), %s195_s30, 4294967168  ;;  %s205_s26 = scalar_lea.sflag [#allocation6], %s751_s19  ;;  %s208_s25 = scalar_lea.vmem [#allocation5], %s428_s29 }
  0x23   : > { %628 = dma.done.wait (%p721_p8), %s205_s26, 128  }
  0x24   : > { %630 = vsyncadd (%p721_p8), %s205_s26, 4294967168  ;;  %s430_s27 = sshll.u32 %s751_s19, 5  ;;  %v246_v0 = vld [vmem:[%s198_s3] sm:$0xff]  ;;  %v247_v1 = vld [vmem:[%s208_s25] sm:$0xff]  ;;  %s436_s21 = sshll.u32 %s649_s12, 5 }
  0x25   : > { %v248_v2 = vand.u32 2147483647, %v246_v0  ;;  %s765_s4 = scalar_lea.vmem [#allocation7], %s430_s27  ;;  %v257_v9 = vmax.f32 %v246_v0, 0.0  ;;  %v258_v10 = vmul.f32 %v247_v1, %v246_v0  ;;  %vm254_vm0 = vcmp.ge.f32.partialorder %v246_v0, 0.0  ;;  %s301_s7 = scalar_lea.hbm %s812_s2, %s436_s21 }
  0x26   : > { %286 = vst [vmem:[%s765_s4 + $0x18] sm:$0xff] %v247_v1  ;;  %s303_s12 = sshll.u32 %s765_s4, 4  ;;  %s305_s8 = sshll.u32 %s301_s7, 4  ;;  %s304_s12 = int_to_ptr.vmem [resolvable:$true] %s303_s12  ;;  %s306_s8 = int_to_ptr.hbm [resolvable:$true] %s305_s8 }
  0x27   : > { %v249_v3 = vsub.f32 0.0, %v248_v2  ;;  %v259_v15 = vsub.f32 %v257_v9, %v258_v10  ;;  %s288_s15 = scalar_lea.sflag [#allocation4], %s751_s19  ;;  %s585_s16 = sshra.s32 %s306_s8, 4  ;;  %s586_s16 = int_to_ptr.hbm [resolvable:$true] %s585_s16 }
  0x28   : > { %s587_s18 = scalar_lea.hbm %s586_s16, 32  ;;  %s591_s29 = scalar_lea.hbm %s812_s2, 64 }
  0x29   : > { %v250_v4 = vmul.f32 1.442695, %v249_v3  ;;  %p588_p4 = scmp.ne.s32.totalorder %s586_s16, %s587_s18  ;;  %p592_p7 = scmp.lt.s32.totalorder %s586_s16, %s812_s2 }
  0x2a   : > { %p593_p8 = scmp.lt.s32.totalorder %s591_s29, %s587_s18 }
  0x2b   : > { %505 = vpow2.f32 %v250_v4  ;;  %p589_p5 = pnand %p588_p4, %p725_p9 }
  0x2c   : > { %p594_p10 = por %p593_p8, %p592_p7 }
  0x2d   : > { %p590_p6 = pneg %p589_p5 }
  0x2f   : > { %p595_p13 = pnand %p594_p10, %p590_p6 }
  0x31   : > { %v506_v5 = vpop.eup %505 }
  0x32   : > { %v252_v6 = vadd.f32 1.0, %v506_v5  ;;  %v263_v7 = vmul.f32 -0.5, %v506_v5  ;;  %v266_v11 = vand.u32 2147483647, %v506_v5 }
  0x34   : > { %507 = vrcp.f32 %v252_v6  ;;  %v264_v8 = vadd.f32 1.0, %v263_v7  ;;  %vm267_vm1 = vcmp.lt.f32.partialorder %v266_v11, 0.0004427343 }
  0x35   : > { %509 = vlog2.f32 %v252_v6 }
  0x36   : > { %v265_v13 = vmul.f32 %v506_v5, %v264_v8 }
  0x3a   : > { %v508_v12 = vpop.eup %507 }
  0x3b   : > { %v510_v14 = vpop.eup %509  ;;  %v255_v16 = vmul.f32 %v508_v12, %v506_v5 }
  0x3c   : > { %v262_v17 = vmul.f32 0.6931472, %v510_v14 }
  0x3d   : > { %v256_v18 = vsel %vm254_vm0, %v508_v12, %v255_v16 }
  0x3e   : > { %v268_v19 = vsel %vm267_vm1, %v265_v13, %v262_v17  ;;  %v271_v20 = vmul.f32 %v256_v18, %v247_v1  ;;  %283 = vst [vmem:[%s765_s4 + $0x10] sm:$0xff] %v256_v18 }
  0x3f   : > { %v269_v21 = vadd.f32 %v268_v19, %v259_v15 }
  0x40   : > { %280 = vst [vmem:[%s765_s4 + $0x8] sm:$0xff] %v271_v20 }
  0x41   : > { %277 = vst [vmem:[%s765_s4] sm:$0xff] %v269_v21 }
  0x42   : > { %598 = shalt.err (!%p595_p13)
}
  0x43   : > { %441 = dma.vmem_to_hbm [thread:$0]  (%p725_p9), %s304_s12, 512, %s306_s8, %s288_s15  }
  0x44 PF: > { %s317_s19 = sand.u32 1, %s637_s9   ;;  %p451_p0 = pnand %p422_p12, %p732_p11 }
  0x45   : > { %s318_s26 = scalar_lea.sflag [#allocation4], %s317_s19 }
  0x46   : > { %p452_p1 = pneg %p451_p0 }
  0x48   : > { %632 = dma.done.wait (%p452_p1), %s318_s26, 512  }
  0x49   : > { %634 = vsyncadd (%p452_p1), %s318_s26, 4294966784  ;;  %s21_s14 = sadd.s32 1, %s657_s14   ;;  %s817_s9 = smov %s641_s10 }
  0x4a   : > { %p18_p2 = scmp.ge.s32.totalorder %s21_s14, 4   ;;  %s818_s10 = smov %s645_s11 }
  0x4b   : > { %s819_s11 = smov %s730_s23  ;;  %s820_s12 = smov %s653_s13 }
  0x4c   : > { %s821_s13 = smov %s823_s17  ;;  %20 = sbr.rel (!%p18_p2) target bundleno = 8 (0x8), region = 90 }
  0x51   :  { %324 = vsyncpa [#allocation3], 1 }
  0x52   :  { %326 = vsyncpa [#allocation3 + $0x1], 1 }
  0x53   :  { %327 = vsyncpa [#allocation6], 1 }
  0x54   :  { %329 = vsyncpa [#allocation6 + $0x1], 1 }
  0x55   :  { %330 = vsyncpa [#allocation4], 1 }
  0x56   :  { %332 = vsyncpa [#allocation4 + $0x1], 1 }

</bundles_post_ra>
